<compile_context>
chip_gen: v7x
topology: tpu7x:2x2x1
jax: 0.10.0
libtpu: 0.0.40
codegen_flags: <defaults>
</compile_context>

<pallas_src>
import functools

import jax
import jax.numpy as jnp
from jax import lax
from jax.experimental import pallas as pl
from jax.experimental.pallas import tpu as pltpu

LANE = 128            # vreg lane width (last dim of every block)
SUBLANE = 8           # vreg sublane count (accumulator rows)
MAX_TILE_ROWS = 2048  # rows per grid step: 2048*128*4B = 1 MiB f32 block


def _make_kernel(gan_type, target_is_real, real_label_val, fake_label_val,
                 n_valid, tile_rows):
    """Build a specialized reduction kernel (all config baked in statically)."""
    gan_type = gan_type.lower()

    def per_element(x):
        if gan_type in ("gan", "ragan"):
            y = real_label_val if target_is_real else fake_label_val
            # Numerically-stable BCEWithLogits:
            #   max(x, 0) - x*y + log(1 + exp(-|x|))
            return (jnp.maximum(x, 0.0) - x * y
                    + jnp.log1p(jnp.exp(-jnp.abs(x))))
        elif gan_type == "lsgan":
            y = real_label_val if target_is_real else fake_label_val
            d = x - y
            return d * d
        elif gan_type == "wgan-gp":
            sign = -1.0 if target_is_real else 1.0
            return sign * x
        else:
            raise NotImplementedError(
                "GAN type [{:s}] is not found".format(gan_type))

    inv_n = 1.0 / float(n_valid)
    groups = tile_rows // SUBLANE          # tile_rows is a multiple of 8

    def kernel(x_ref, o_ref, acc_ref):
        i = pl.program_id(0)
        last = pl.num_programs(0) - 1

        @pl.when(i == 0)
        def _():
            acc_ref[...] = jnp.zeros_like(acc_ref)

        # Cast per-tile in VMEM (input arrives in its native dtype; casting in
        # the wrapper would double HBM read traffic for bf16 inputs).
        x = x_ref[...].astype(jnp.float32)        # (tile_rows, LANE)
        per = per_element(x)

        # Steady state: lane/sublane-parallel accumulation, no masking.
        @pl.when(i != last)
        def _():
            acc_ref[...] += per.reshape(groups, SUBLANE, LANE).sum(axis=0)

        # Last step: mask the zero-padding / out-of-bounds tail (padding only
        # ever lives in the final block), then reduce to the scalar mean.
        @pl.when(i == last)
        def _():
            # NOTE: flat index is int32 -> valid for inputs < 2**31 elements.
            row_ids = lax.broadcasted_iota(jnp.int32, (tile_rows, LANE), 0)
            col_ids = lax.broadcasted_iota(jnp.int32, (tile_rows, LANE), 1)
            flat_idx = (row_ids + i * tile_rows) * LANE + col_ids
            per_m = jnp.where(flat_idx < n_valid, per, 0.0)
            acc_ref[...] += per_m.reshape(groups, SUBLANE, LANE).sum(axis=0)
            o_ref[...] = jnp.sum(acc_ref[...], keepdims=True) * inv_n

    return kernel


@functools.partial(jax.jit,
                   static_argnames=("gan_type", "target_is_real",
                                    "real_label_val", "fake_label_val",
                                    "max_tile_rows"))
def gan_loss(x, *, gan_type, target_is_real,
             real_label_val=1.0, fake_label_val=0.0,
             max_tile_rows=MAX_TILE_ROWS):
    """Pallas implementation of GANLoss.forward(input, target_is_real)."""
    n_valid = x.size
    # Flatten in the native dtype (bitcast) — the f32 cast happens per-tile
    # inside the kernel, not as an extra full-array HBM pass.
    x_flat = x.reshape(-1)

    rows = pl.cdiv(n_valid, LANE)
    rows8 = ((rows + SUBLANE - 1) // SUBLANE) * SUBLANE
    pad = rows8 * LANE - n_valid
    if pad:
        # Only taken when n is not a multiple of 1024 (= LANE * SUBLANE); the
        # common aligned NCHW sizes skip this copy and reshape is a bitcast.
        x_flat = jnp.pad(x_flat, (0, pad))
    x2d = x_flat.reshape(rows8, LANE)

    tile_rows = min(int(max_tile_rows), rows8)   # multiple of 8, <= rows8
    # Ragged final block (when rows8 % tile_rows != 0) is handled by Pallas'
    # edge-block padding plus the in-kernel mask — no HBM pad copy needed.
    grid = (pl.cdiv(rows8, tile_rows),)

    kernel = _make_kernel(gan_type, bool(target_is_real),
                          float(real_label_val), float(fake_label_val),
                          n_valid, tile_rows)

    out = pl.pallas_call(
        kernel,
        out_shape=jax.ShapeDtypeStruct((1, 1), jnp.float32),
        grid_spec=pltpu.PrefetchScalarGridSpec(
            num_scalar_prefetch=0,
            grid=grid,
            in_specs=[pl.BlockSpec((tile_rows, LANE), lambda i: (i, 0))],
            out_specs=pl.BlockSpec((1, 1), lambda i: (0, 0)),
            scratch_shapes=[pltpu.VMEM((SUBLANE, LANE), jnp.float32)],
        ),
        compiler_params=pltpu.CompilerParams(
            dimension_semantics=("arbitrary",)),   # sequential reduction axis
    )(x2d)
    return out[0, 0]


# ---------------------------------------------------------------- reference --
def _ref_loss(x, gan_type, target_is_real, real_label_val=1.0,
              fake_label_val=0.0):
    x = x.astype(jnp.float32)
    gan_type = gan_type.lower()
    if gan_type == "wgan-gp":
        return -jnp.mean(x) if target_is_real else jnp.mean(x)
    y = real_label_val if target_is_real else fake_label_val
    if gan_type in ("gan", "ragan"):
        per = jnp.maximum(x, 0.0) - x * y + jnp.log1p(jnp.exp(-jnp.abs(x)))
        return jnp.mean(per)
    elif gan_type == "lsgan":
        return jnp.mean((x - y) ** 2)
    raise NotImplementedError(gan_type)


if __name__ == "__main__":
    key = jax.random.PRNGKey(0)
    k0, k1 = jax.random.split(key)

    # Discriminator logits, NCHW like the PyTorch module expects.
    x = jax.random.normal(k0, (2, 4, 16, 16), dtype=jnp.float32)   # aligned
    # Unaligned size (1800 elems): exercises LANE padding + in-kernel mask.
    x_u = jax.random.normal(k1, (2, 1, 30, 30), dtype=jnp.float32)
    x_bf16 = x.astype(jnp.bfloat16)                                # native bf16

    for gt in ("gan", "ragan", "lsgan", "wgan-gp"):
        for real in (True, False):
            # 1) aligned input, single large block.
            out = jax.block_until_ready(gan_loss(x, gan_type=gt,
                                                 target_is_real=real))
            ref = _ref_loss(x, gt, real)
            assert jnp.allclose(out, ref, atol=1e-5, rtol=1e-5), \
                ("aligned", gt, real, out, ref)

            # 2) unaligned input + forced multi-block grid (exercises the
            #    steady-state/epilogue split and padding mask).
            out_u = jax.block_until_ready(gan_loss(x_u, gan_type=gt,
                                                   target_is_real=real,
                                                   max_tile_rows=8))
            ref_u = _ref_loss(x_u, gt, real)
            assert jnp.allclose(out_u, ref_u, atol=1e-5, rtol=1e-5), \
                ("unaligned", gt, real, out_u, ref_u)

            # 3) native bf16 input (no wrapper-side cast).
            out_b = jax.block_until_ready(gan_loss(x_bf16, gan_type=gt,
                                                   target_is_real=real))
            ref_b = _ref_loss(x_bf16, gt, real)
            assert jnp.allclose(out_b, ref_b, atol=1e-4, rtol=1e-4), \
                ("bf16", gt, real, out_b, ref_b)

    print("KERNEL_OK")
</pallas_src>

<mosaic_0001>
module attributes {stable_mosaic.version = 11 : i64} {
  func.func @kernel(%arg0: i32, %arg1: memref<16x128xf32, #tpu.memory_space<vmem>>, %arg2: memref<1x1xf32, #tpu.memory_space<vmem>>, %arg3: memref<8x128xf32, #tpu.memory_space<vmem>>) attributes {dimension_semantics = [#tpu.dimension_semantics<arbitrary>], iteration_bounds = array<i64: 1>, scalar_prefetch = 0 : i64, scratch_operands = 1 : i64, tpu.core_type = #tpu.core_type<tc>, window_params = [{transform_indices = @transform_0, window_bounds = array<i64: 16, 128>}, {pipeline_mode = #tpu.pipeline_mode<synchronous>, transform_indices = @transform_1, window_bounds = array<i64: 1, 1>}]} {
    %c0_i32 = arith.constant 0 : i32
    %0 = arith.cmpi eq, %arg0, %c0_i32 : i32
    %1 = arith.extui %0 : i1 to i32
    %c0_i32_0 = arith.constant 0 : i32
    %2 = arith.cmpi ne, %1, %c0_i32_0 : i32
    scf.if %2 {
      %cst_8 = arith.constant 0.000000e+00 : f32
      %21 = vector.broadcast %cst_8 : f32 to vector<8x128xf32>
      %c0_9 = arith.constant 0 : index
      %c0_10 = arith.constant 0 : index
      %22 = vector.load %arg3[%c0_9, %c0_10] : memref<8x128xf32, #tpu.memory_space<vmem>>, vector<8x128xf32>
      tpu.vector_store %arg3[%c0_9, %c0_10], %21 {strides = array<i32>} : memref<8x128xf32, #tpu.memory_space<vmem>>, vector<8x128xf32>,
    } else {
    }
    %c0 = arith.constant 0 : index
    %c0_1 = arith.constant 0 : index
    %3 = vector.load %arg1[%c0, %c0_1] : memref<16x128xf32, #tpu.memory_space<vmem>>, vector<16x128xf32>
    %cst = arith.constant 0.000000e+00 : f32
    %4 = vector.broadcast %cst : f32 to vector<16x128xf32>
    %5 = arith.maximumf %3, %4 : vector<16x128xf32>
    %cst_2 = arith.constant 1.000000e+00 : f32
    %6 = vector.broadcast %cst_2 : f32 to vector<16x128xf32>
    %7 = arith.mulf %3, %6 : vector<16x128xf32>
    %8 = arith.subf %5, %7 : vector<16x128xf32>
    %9 = math.absf %3 : vector<16x128xf32>
    %cst_3 = arith.constant 0.000000e+00 : f32
    %10 = vector.broadcast %cst_3 : f32 to vector<16x128xf32>
    %11 = arith.subf %10, %9 : vector<16x128xf32>
    %12 = math.exp %11 : vector<16x128xf32>
    %13 = math.log1p %12 : vector<16x128xf32>
    %14 = arith.addf %8, %13 : vector<16x128xf32>
    %c0_i32_4 = arith.constant 0 : i32
    %15 = arith.cmpi ne, %arg0, %c0_i32_4 : i32
    %16 = arith.extui %15 : i1 to i32
    %c0_i32_5 = arith.constant 0 : i32
    %17 = arith.cmpi ne, %16, %c0_i32_5 : i32
    scf.if %17 {
      %c0_8 = arith.constant 0 : index
      %c0_9 = arith.constant 0 : index
      %21 = vector.load %arg3[%c0_8, %c0_9] : memref<8x128xf32, #tpu.memory_space<vmem>>, vector<8x128xf32>
      %22 = vector.shape_cast %14 : vector<16x128xf32> to vector<2x8x128xf32>
      %cst_10 = arith.constant dense<0.000000e+00> : vector<8x128xf32>
      %23 = vector.multi_reduction <add>, %22, %cst_10 [0] : vector<2x8x128xf32> to vector<8x128xf32>
      %24 = arith.addf %21, %23 : vector<8x128xf32>
      %c0_11 = arith.constant 0 : index
      %c0_12 = arith.constant 0 : index
      %25 = vector.load %arg3[%c0_11, %c0_12] : memref<8x128xf32, #tpu.memory_space<vmem>>, vector<8x128xf32>
      tpu.vector_store %arg3[%c0_11, %c0_12], %24 {strides = array<i32>} : memref<8x128xf32, #tpu.memory_space<vmem>>, vector<8x128xf32>,
    } else {
    }
    %c0_i32_6 = arith.constant 0 : i32
    %18 = arith.cmpi eq, %arg0, %c0_i32_6 : i32
    %19 = arith.extui %18 : i1 to i32
    %c0_i32_7 = arith.constant 0 : i32
    %20 = arith.cmpi ne, %19, %c0_i32_7 : i32
    scf.if %20 {
      %21 = tpu.iota {dimensions = array<i32: 0>} : vector<16x128xi32>
      %22 = tpu.iota {dimensions = array<i32: 1>} : vector<16x128xi32>
      %c16_i32 = arith.constant 16 : i32
      %23 = arith.muli %arg0, %c16_i32 : i32
      %24 = vector.broadcast %23 : i32 to vector<16x128xi32>
      %25 = arith.addi %21, %24 : vector<16x128xi32>
      %c128_i32 = arith.constant 128 : i32
      %26 = vector.broadcast %c128_i32 : i32 to vector<16x128xi32>
      %27 = arith.muli %25, %26 : vector<16x128xi32>
      %28 = arith.addi %27, %22 : vector<16x128xi32>
      %c2048_i32 = arith.constant 2048 : i32
      %29 = vector.broadcast %c2048_i32 : i32 to vector<16x128xi32>
      %30 = arith.cmpi slt, %28, %29 : vector<16x128xi32>
      %cst_8 = arith.constant 0.000000e+00 : f32
      %31 = vector.broadcast %cst_8 : f32 to vector<16x128xf32>
      %32 = arith.select %30, %14, %31 : vector<16x128xi1>, vector<16x128xf32>
      %c0_9 = arith.constant 0 : index
      %c0_10 = arith.constant 0 : index
      %33 = vector.load %arg3[%c0_9, %c0_10] : memref<8x128xf32, #tpu.memory_space<vmem>>, vector<8x128xf32>
      %34 = vector.shape_cast %32 : vector<16x128xf32> to vector<2x8x128xf32>
      %cst_11 = arith.constant dense<0.000000e+00> : vector<8x128xf32>
      %35 = vector.multi_reduction <add>, %34, %cst_11 [0] : vector<2x8x128xf32> to vector<8x128xf32>
      %36 = arith.addf %33, %35 : vector<8x128xf32>
      %c0_12 = arith.constant 0 : index
      %c0_13 = arith.constant 0 : index
      %37 = vector.load %arg3[%c0_12, %c0_13] : memref<8x128xf32, #tpu.memory_space<vmem>>, vector<8x128xf32>
      tpu.vector_store %arg3[%c0_12, %c0_13], %36 {strides = array<i32>} : memref<8x128xf32, #tpu.memory_space<vmem>>, vector<8x128xf32>,
      %c0_14 = arith.constant 0 : index
      %c0_15 = arith.constant 0 : index
      %38 = vector.load %arg3[%c0_14, %c0_15] : memref<8x128xf32, #tpu.memory_space<vmem>>, vector<8x128xf32>
      %39 = vector.shape_cast %38 : vector<8x128xf32> to vector<1x8x128xf32>
      %cst_16 = arith.constant dense<0.000000e+00> : vector<1xf32>
      %40 = vector.multi_reduction <add>, %39, %cst_16 [1, 2] : vector<1x8x128xf32> to vector<1xf32>
      %41 = vector.shape_cast %40 : vector<1xf32> to vector<1x1x1xf32>
      %42 = vector.extract %41[0, 0, 0] : f32 from vector<1x1x1xf32>
      %43 = vector.broadcast %42 : f32 to vector<1x1xf32>
      %cst_17 = arith.constant 4.8828125E-4 : f32
      %44 = vector.broadcast %cst_17 : f32 to vector<1x1xf32>
      %45 = arith.mulf %43, %44 : vector<1x1xf32>
      %c0_18 = arith.constant 0 : index
      %c0_19 = arith.constant 0 : index
      %46 = vector.load %arg2[%c0_18, %c0_19] : memref<1x1xf32, #tpu.memory_space<vmem>>, vector<1x1xf32>
      tpu.vector_store %arg2[%c0_18, %c0_19], %45 {strides = array<i32>} : memref<1x1xf32, #tpu.memory_space<vmem>>, vector<1x1xf32>,
    } else {
    }
    return
  }
  func.func @transform_0(%arg0: i32) -> (i32, i32) {
    %c0_i32 = arith.constant 0 : i32
    %c0_i32_0 = arith.constant 0 : i32
    return %arg0, %c0_i32 : i32, i32
  }
  func.func @transform_1(%arg0: i32) -> (i32, i32) {
    %c0_i32 = arith.constant 0 : i32
    %c0_i32_0 = arith.constant 0 : i32
    %c0_i32_1 = arith.constant 0 : i32
    return %c0_i32, %c0_i32_0 : i32, i32
  }
}

</mosaic_0001>

<bundles_post_ra>
// kernel: gan_loss.1
= control target key start
LH: loop header
LB: loop body
LE: loop exit
PB: predicated region body
PF: predicated region fallthrough
CT: control target
= control target key end

     0   :  { %s172_s0 = inlined_call_operand.vmem [shape: f32[16,128], index: 0, kind: input, shape index: {}]   ;;  %s173_s1 = inlined_call_operand.hbm [shape: f32[1,1], index: 1, kind: output, shape index: {}]  }
   0x1   :  { %v14_v0 = vld [vmem:[%s172_s0] sm:$0xff]  ;;  %v15_v1 = vld [vmem:[%s172_s0 + $0x8] sm:$0xff] }
   0x2   :  { %6 = vsyncpa [#allocation4], 0  ;;  %v20_v2 = vand.u32 2147483647, %v14_v0  ;;  %v21_v3 = vand.u32 2147483647, %v15_v1  ;;  %v59_v8 = vlaneseq }
   0x3   :  { %v16_v20 = vmax.f32 %v14_v0, 0.0  ;;  %v17_v24 = vmax.f32 %v15_v1, 0.0  ;;  %s143_s0 = smov [#allocation3]   ;;  %vm92_vm4 = vcmask 0  }
   0x4   :  { %v22_v4 = vsub.f32 0.0, %v20_v2  ;;  %v23_v5 = vsub.f32 0.0, %v21_v3  ;;  %v60_v12 = vshrl.u32 %v59_v8, 7  ;;  %v63_v18 = vand.u32 127, %v59_v8  ;;  %s100_s10 = sshll.u32 %s143_s0, 4  ;;  %s101_s10 = int_to_ptr.vmem [resolvable:$true] %s100_s10 }
   0x5   :  { %v18_v29 = vsub.f32 %v16_v20, %v14_v0  ;;  %v19_v33 = vsub.f32 %v17_v24, %v15_v1  ;;  %s119_s12 = scalar_lea.vmem %s101_s10, 16  ;;  %s123_s13 = scalar_lea.vmem %s101_s10, 32 }
   0x6   :  { %v24_v6 = vmul.f32 1.442695, %v22_v4  ;;  %v26_v7 = vmul.f32 1.442695, %v23_v5  ;;  %v61_v16 = vadd.s32 8, %v60_v12  ;;  %v68_v19 = vmul.u32 128, %v60_v12  ;;  %p120_p0 = scmp.ne.s32.totalorder %s101_s10, %s119_s12  ;;  %p124_p1 = scmp.lt.s32.totalorder %s101_s10, %s101_s10 }
   0x7   :  { %p125_p2 = scmp.lt.s32.totalorder %s123_s13, %s119_s12 }
   0x8   :  { %111 = vpow2.f32 %v24_v6  ;;  %v69_v23 = vmul.u32 128, %v61_v16  ;;  %v70_v27 = vadd.s32 %v68_v19, %v63_v18 }
   0x9   :  { %113 = vpow2.f32 %v26_v7  ;;  %p126_p3 = por %p125_p2, %p124_p1 }
   0xa   :  { %v71_v31 = vadd.s32 %v69_v23, %v63_v18  ;;  %vm72_vm2 = vcmp.lt.s32.totalorder %v70_v27, 2048 }
   0xb   :  { %p127_p4 = pnand %p126_p3, %p120_p0 }
   0xc   :  { %vm73_vm3 = vcmp.lt.s32.totalorder %v71_v31, 2048 }
  0x12   :  { %v112_v9 = vpop.eup %111 }
  0x13   :  { %v114_v10 = vpop.eup %113  ;;  %v28_v11 = vadd.f32 1.0, %v112_v9  ;;  %v31_v14 = vmul.f32 -0.5, %v112_v9  ;;  %v34_v21 = vand.u32 2147483647, %v112_v9 }
  0x14   :  { %v37_v13 = vadd.f32 1.0, %v114_v10  ;;  %v40_v15 = vmul.f32 -0.5, %v114_v10  ;;  %v43_v25 = vand.u32 2147483647, %v114_v10 }
  0x15   :  { %115 = vlog2.f32 %v28_v11  ;;  %v32_v17 = vadd.f32 1.0, %v31_v14  ;;  %vm35_vm0 = vcmp.lt.f32.partialorder %v34_v21, 0.0004427343 }
  0x16   :  { %117 = vlog2.f32 %v37_v13  ;;  %v41_v22 = vadd.f32 1.0, %v40_v15  ;;  %vm44_vm1 = vcmp.lt.f32.partialorder %v43_v25, 0.0004427343 }
  0x17   :  { %v33_v26 = vmul.f32 %v112_v9, %v32_v17 }
  0x18   :  { %v42_v30 = vmul.f32 %v114_v10, %v41_v22 }
  0x1f   :  { %v116_v28 = vpop.eup %115 }
  0x20   :  { %v118_v32 = vpop.eup %117  ;;  %v30_v34 = vmul.f32 0.6931472, %v116_v28 }
  0x21   :  { %v39_v35 = vmul.f32 0.6931472, %v118_v32 }
  0x22   :  { %v36_v36 = vsel %vm35_vm0, %v33_v26, %v30_v34 }
  0x23   :  { %v45_v37 = vsel %vm44_vm1, %v42_v30, %v39_v35  ;;  %v46_v38 = vadd.f32 %v36_v36, %v18_v29 }
  0x24   :  { %v47_v39 = vadd.f32 %v45_v37, %v19_v33 }
  0x25   :  { %v74_v40 = vsel %vm72_vm2, %v46_v38, 0.0 }
  0x26   :  { %v75_v41 = vsel %vm73_vm3, %v47_v39, 0.0 }
  0x27   :  { %v77_v42 = vadd.f32 %v75_v41, %v74_v40 }
  0x29   :  { %81 = vadd.xlane.f32.xlu0 %v77_v42 }
  0xb6   :  { %v82_v43 = vpop.xlane.xlu0 %81 }
  0xb7   :  { %v83_v44 = vrot.slane %v82_v43, 4 }
  0xb9   :  { %v84_v45 = vadd.f32 %v83_v44, %v82_v43 }
  0xbb   :  { %v85_v46 = vrot.slane %v84_v45, 2 }
  0xbd   :  { %v86_v47 = vadd.f32 %v85_v46, %v84_v45 }
  0xbf   :  { %v87_v48 = vrot.slane %v86_v47, 1 }
  0xc1   :  { %v88_v49 = vadd.f32 %v87_v48, %v86_v47 }
  0xc3   :  { %108 = vpush %v88_v49 }
  0xf4   :  { %s109_s11 = spop %108 }
  0xf5   :  { %v90_v50 = vstv %s109_s11 }
  0xf6   :  { %v91_v51 = vmul.f32 0.00048828125, %v90_v50 }
  0xf8   :  { %93 = vst.msk [vmem:[#allocation3] sm:$0x1] %vm92_vm4, %v91_v51 }
  0xf9   :  { %130 = shalt.err (!%p127_p4)
}
  0xfa   :  { %s131_s16 = scalar_lea.hbm %s173_s1, 16 }
  0xfb   :  { %p132_p5 = scmp.ne.s32.totalorder %s173_s1, %s131_s16  ;;  %p135_p6 = scmp.lt.u32.totalorder %s131_s16, %s173_s1 }
  0xfd   :  { %p137_p7 = pnand %p135_p6, %p132_p5 }
  0xff   :  { %140 = shalt.err (!%p137_p7)
}
 0x100   :  { %103 = dma.vmem_to_hbm [thread:$0]  %s101_s10, 16, %s173_s1, [#allocation4]  }
 0x101   :  { %141 = dma.done.wait [#allocation4], 16  }
 0x102   :  { %142 = vsyncadd [#allocation4], 4294967280 }
 0x103   :  { %107 = vsyncpa [#allocation4], 1 }

</bundles_post_ra>
